<compile_context>
chip_gen: v7x
topology: tpu7x:2x2x1
jax: 0.10.0
libtpu: 0.0.40
codegen_flags: <defaults>
</compile_context>

<pallas_src>
import functools
from math import sqrt

import jax
import jax.numpy as jnp
from jax import lax
from jax.experimental import pallas as pl
from jax.experimental.pallas import tpu as pltpu


def _relpos_outer_sum_kernel(tf_row_ref, tf_col_ref, wi_t_ref, wj_t_ref,
                             rel_tab_ref, out_ref, *, relpos_k):
    """One (batch, row-tile, col-tile) grid step.

    tf_row_ref : (1, TM, tf_dim)   row block of tf for emb_i
    tf_col_ref : (1, TN, tf_dim)   column block of tf for emb_j
    wi_t_ref   : (tf_dim, c_z)     pre-transposed linear_tf_z_i weight
    wj_t_ref   : (tf_dim, c_z)     pre-transposed linear_tf_z_j weight
    rel_tab_ref: (no_bins, c_z)    wr.T + br + bi + bj  (all biases folded)
    out_ref    : (1, TM, TN, c_z)
    """
    tm = tf_row_ref.shape[1]
    tn = tf_col_ref.shape[1]
    no_bins = rel_tab_ref.shape[0]
    c_z = rel_tab_ref.shape[1]

    row0 = pl.program_id(1) * tm
    col0 = pl.program_id(2) * tn

    # --- projections (MXU, no bias: biases live in rel_table) --------------
    emb_i = jnp.dot(tf_row_ref[0], wi_t_ref[...],
                    preferred_element_type=jnp.float32)            # (TM, c_z)
    emb_j = jnp.dot(tf_col_ref[0], wj_t_ref[...],
                    preferred_element_type=jnp.float32)            # (TN, c_z)

    # --- relative position bins for this tile -------------------------------
    # d = i - j ; argmin(|d - (-k..k)|) == clip(d, -k, k) + k (integer d, no ties)
    ii = row0 + lax.broadcasted_iota(jnp.int32, (tm, tn), 0)
    jj = col0 + lax.broadcasted_iota(jnp.int32, (tm, tn), 1)
    bin_idx = jnp.clip(ii - jj, -relpos_k, relpos_k) + relpos_k    # (TM, TN)

    bins = lax.broadcasted_iota(jnp.int32, (tm, tn, no_bins), 2)
    one_hot = (bin_idx[..., None] == bins).astype(jnp.float32)     # (TM, TN, bins)

    rel = jnp.dot(one_hot.reshape(tm * tn, no_bins), rel_tab_ref[...],
                  preferred_element_type=jnp.float32)              # (TM*TN, c_z)
    rel = rel.reshape(tm, tn, c_z)

    # --- outer sum broadcast -------------------------------------------------
    pair = rel + emb_i[:, None, :] + emb_j[None, :, :]             # (TM, TN, c_z)
    out_ref[0] = pair.astype(out_ref.dtype)


def _tile_candidates(n):
    """Tile sizes that divide n and are a multiple of 8 (or equal n)."""
    return sorted([d for d in range(1, n + 1)
                   if n % d == 0 and (d % 8 == 0 or d == n)], reverse=True)


def _choose_tiles(n, tf_dim, c_z, no_bins, out_itemsize,
                  budget_bytes=40 * 1024 * 1024):
    """Pick (TM, TN): largest tiles fitting the VMEM budget; prefer TN = N."""
    def est(tm, tn):
        out_blk = tm * tn * c_z * out_itemsize * 2              # double-buffered out
        tf_blk = (tm + tn) * tf_dim * 4 * 2                     # double-buffered tf
        w_blk = (2 * tf_dim * c_z + no_bins * c_z) * 4 * 2      # weights/table
        inter = tm * tn * no_bins * 4 + 2 * tm * tn * c_z * 4   # one_hot, rel, pair
        return out_blk + tf_blk + w_blk + inter

    cands = _tile_candidates(n)

    # Prefer full-width column tiles (fully contiguous output DMA per row).
    for tm in cands:
        if est(tm, n) <= budget_bytes:
            return tm, n

    # Otherwise tile columns too; maximize tile area, prefer wide columns.
    best = None
    for tn in cands:
        for tm in cands:
            if est(tm, tn) <= budget_bytes:
                key = (tm * tn, tn)
                if best is None or key > best[0]:
                    best = (key, (tm, tn))
    if best is not None:
        return best[1]
    return cands[-1], cands[-1]


def relpos_encoding_outer_sum(tf, params, relpos_k, *, tm=None, tn=None):
    """tf: [B, N, tf_dim] -> [B, N, N, c_z]"""
    B, N, tf_dim = tf.shape
    wi, bi, wj, bj, wr, br = (params["wi"], params["bi"], params["wj"],
                              params["bj"], params["wr"], params["br"])
    c_z = wi.shape[0]
    no_bins = 2 * relpos_k + 1
    assert wr.shape == (c_z, no_bins)

    # Pre-transpose projection weights; fold ALL biases into the relpos table.
    wi_t = jnp.asarray(wi).T                                   # (tf_dim, c_z)
    wj_t = jnp.asarray(wj).T                                   # (tf_dim, c_z)
    rel_table = jnp.asarray(wr).T + (bi + bj + br)[None, :]    # (no_bins, c_z)

    out_dtype = tf.dtype
    auto_tm, auto_tn = _choose_tiles(N, tf_dim, c_z, no_bins,
                                     jnp.dtype(out_dtype).itemsize)
    tm = auto_tm if tm is None else tm
    tn = auto_tn if tn is None else tn
    assert N % tm == 0 and N % tn == 0

    kernel = functools.partial(_relpos_outer_sum_kernel, relpos_k=relpos_k)

    return pl.pallas_call(
        kernel,
        out_shape=jax.ShapeDtypeStruct((B, N, N, c_z), out_dtype),
        grid_spec=pltpu.PrefetchScalarGridSpec(
            num_scalar_prefetch=0,
            grid=(B, N // tm, N // tn),
            in_specs=[
                pl.BlockSpec((1, tm, tf_dim), lambda b, i, j: (b, i, 0)),  # tf rows
                pl.BlockSpec((1, tn, tf_dim), lambda b, i, j: (b, j, 0)),  # tf cols
                pl.BlockSpec((tf_dim, c_z), lambda b, i, j: (0, 0)),       # wi.T
                pl.BlockSpec((tf_dim, c_z), lambda b, i, j: (0, 0)),       # wj.T
                pl.BlockSpec((no_bins, c_z), lambda b, i, j: (0, 0)),      # rel table
            ],
            out_specs=pl.BlockSpec((1, tm, tn, c_z),
                                   lambda b, i, j: (b, i, j, 0)),
        ),
        compiler_params=pltpu.CompilerParams(
            dimension_semantics=("parallel", "parallel", "parallel"),
            vmem_limit_bytes=64 * 1024 * 1024),
    )(tf, tf, wi_t, wj_t, rel_table)


def _init_linear(key, out_f, in_f):
    # Deterministic init mimicking nn.Linear default: U(-1/sqrt(in_f), 1/sqrt(in_f))
    k1, k2 = jax.random.split(key)
    lim = 1.0 / sqrt(in_f)
    w = jax.random.uniform(k1, (out_f, in_f), jnp.float32, -lim, lim)
    b = jax.random.uniform(k2, (out_f,), jnp.float32, -lim, lim)
    return w, b


def _reference(tf, params, relpos_k):
    """Plain-JAX reference identical to the PyTorch forward."""
    B, N, _ = tf.shape
    ri = jnp.broadcast_to(jnp.arange(N, dtype=jnp.float32)[None, :], (B, N))
    d = ri[..., None] - ri[..., None, :]
    boundaries = jnp.arange(-relpos_k, relpos_k + 1, dtype=jnp.float32)
    d = jnp.abs(d[..., None] - boundaries)
    idx = jnp.argmin(d, axis=-1)
    oh = jax.nn.one_hot(idx, 2 * relpos_k + 1, dtype=tf.dtype)
    rel = oh @ params["wr"].T + params["br"]
    emb_i = tf @ params["wi"].T + params["bi"]
    emb_j = tf @ params["wj"].T + params["bj"]
    return rel + emb_i[:, :, None, :] + emb_j[:, None, :, :]


if __name__ == "__main__":
    # Small shapes consistent with the module: batch=2, N_res=8, tf_dim=32, c_z=16
    B, N, tf_dim, c_z, relpos_k = 2, 8, 32, 16, 4

    key = jax.random.PRNGKey(0)
    k_tf, k_i, k_j, k_r = jax.random.split(key, 4)

    tf = jax.random.normal(k_tf, (B, N, tf_dim), jnp.float32)
    wi, bi = _init_linear(k_i, c_z, tf_dim)
    wj, bj = _init_linear(k_j, c_z, tf_dim)
    wr, br = _init_linear(k_r, c_z, 2 * relpos_k + 1)
    params = {"wi": wi, "bi": bi, "wj": wj, "bj": bj, "wr": wr, "br": br}

    out = relpos_encoding_outer_sum(tf, params, relpos_k)
    out = jax.block_until_ready(out)

    ref = _reference(tf, params, relpos_k)
    assert out.shape == (B, N, N, c_z)
    assert jnp.allclose(out, ref, atol=1e-5, rtol=1e-5), "mismatch vs reference"

    print("KERNEL_OK")
</pallas_src>

<mosaic_0001>
module attributes {stable_mosaic.version = 11 : i64} {
  func.func @_relpos_outer_sum_kernel(%arg0: i32, %arg1: i32, %arg2: i32, %arg3: memref<1x8x32xf32, #tpu.memory_space<vmem>>, %arg4: memref<1x8x32xf32, #tpu.memory_space<vmem>>, %arg5: memref<32x16xf32, #tpu.memory_space<vmem>>, %arg6: memref<32x16xf32, #tpu.memory_space<vmem>>, %arg7: memref<9x16xf32, #tpu.memory_space<vmem>>, %arg8: memref<1x8x8x16xf32, #tpu.memory_space<vmem>>) attributes {dimension_semantics = [#tpu.dimension_semantics<parallel>, #tpu.dimension_semantics<parallel>, #tpu.dimension_semantics<parallel>], iteration_bounds = array<i64: 2, 1, 1>, scalar_prefetch = 0 : i64, scratch_operands = 0 : i64, tpu.core_type = #tpu.core_type<tc>, window_params = [{transform_indices = @transform_0, window_bounds = array<i64: 1, 8, 32>}, {transform_indices = @transform_1, window_bounds = array<i64: 1, 8, 32>}, {pipeline_mode = #tpu.pipeline_mode<synchronous>, transform_indices = @transform_2, window_bounds = array<i64: 32, 16>}, {pipeline_mode = #tpu.pipeline_mode<synchronous>, transform_indices = @transform_3, window_bounds = array<i64: 32, 16>}, {pipeline_mode = #tpu.pipeline_mode<synchronous>, transform_indices = @transform_4, window_bounds = array<i64: 9, 16>}, {transform_indices = @transform_5, window_bounds = array<i64: 1, 8, 8, 16>}]} {
    %c8_i32 = arith.constant 8 : i32
    %0 = arith.muli %arg1, %c8_i32 : i32
    %c8_i32_0 = arith.constant 8 : i32
    %1 = arith.muli %arg2, %c8_i32_0 : i32
    %c0 = arith.constant 0 : index
    %c0_1 = arith.constant 0 : index
    %c0_2 = arith.constant 0 : index
    %2 = vector.load %arg3[%c0, %c0_1, %c0_2] : memref<1x8x32xf32, #tpu.memory_space<vmem>>, vector<1x8x32xf32>
    %3 = vector.shape_cast %2 : vector<1x8x32xf32> to vector<8x32xf32>
    %c0_3 = arith.constant 0 : index
    %c0_4 = arith.constant 0 : index
    %4 = vector.load %arg5[%c0_3, %c0_4] : memref<32x16xf32, #tpu.memory_space<vmem>>, vector<32x16xf32>
    %cst = arith.constant dense<0.000000e+00> : vector<8x16xf32>
    %5 = tpu.matmul %3, %4, %cst {dimension_numbers = #tpu.dot_dimension_numbers<[1], [0], [0], [1], [0, 0, 1, 1], [], []>} : vector<8x32xf32>, vector<32x16xf32>, vector<8x16xf32> -> vector<8x16xf32>
    %c0_5 = arith.constant 0 : index
    %c0_6 = arith.constant 0 : index
    %c0_7 = arith.constant 0 : index
    %6 = vector.load %arg4[%c0_5, %c0_6, %c0_7] : memref<1x8x32xf32, #tpu.memory_space<vmem>>, vector<1x8x32xf32>
    %7 = vector.shape_cast %6 : vector<1x8x32xf32> to vector<8x32xf32>
    %c0_8 = arith.constant 0 : index
    %c0_9 = arith.constant 0 : index
    %8 = vector.load %arg6[%c0_8, %c0_9] : memref<32x16xf32, #tpu.memory_space<vmem>>, vector<32x16xf32>
    %cst_10 = arith.constant dense<0.000000e+00> : vector<8x16xf32>
    %9 = tpu.matmul %7, %8, %cst_10 {dimension_numbers = #tpu.dot_dimension_numbers<[1], [0], [0], [1], [0, 0, 1, 1], [], []>} : vector<8x32xf32>, vector<32x16xf32>, vector<8x16xf32> -> vector<8x16xf32>
    %10 = tpu.iota {dimensions = array<i32: 0>} : vector<8x8xi32>
    %11 = vector.broadcast %0 : i32 to vector<8x8xi32>
    %12 = arith.addi %11, %10 : vector<8x8xi32>
    %13 = tpu.iota {dimensions = array<i32: 1>} : vector<8x8xi32>
    %14 = vector.broadcast %1 : i32 to vector<8x8xi32>
    %15 = arith.addi %14, %13 : vector<8x8xi32>
    %16 = arith.subi %12, %15 : vector<8x8xi32>
    %c-4_i32 = arith.constant -4 : i32
    %c4_i32 = arith.constant 4 : i32
    %17 = vector.broadcast %c-4_i32 : i32 to vector<8x8xi32>
    %18 = arith.maxsi %17, %16 : vector<8x8xi32>
    %19 = vector.broadcast %c4_i32 : i32 to vector<8x8xi32>
    %20 = arith.minsi %19, %18 : vector<8x8xi32>
    %c4_i32_11 = arith.constant 4 : i32
    %21 = vector.broadcast %c4_i32_11 : i32 to vector<8x8xi32>
    %22 = arith.addi %20, %21 : vector<8x8xi32>
    %23 = tpu.iota {dimensions = array<i32: 2>} : vector<8x8x9xi32>
    %24 = vector.shape_cast %22 : vector<8x8xi32> to vector<8x8x1xi32>
    %25 = vector.broadcast %24 : vector<8x8x1xi32> to vector<8x8x9xi32>
    %26 = arith.cmpi eq, %25, %23 : vector<8x8x9xi32>
    %27 = arith.extui %26 : vector<8x8x9xi1> to vector<8x8x9xi32>
    %28 = arith.sitofp %27 : vector<8x8x9xi32> to vector<8x8x9xf32>
    %29 = vector.shape_cast %28 : vector<8x8x9xf32> to vector<64x9xf32>
    %c0_12 = arith.constant 0 : index
    %c0_13 = arith.constant 0 : index
    %30 = vector.load %arg7[%c0_12, %c0_13] : memref<9x16xf32, #tpu.memory_space<vmem>>, vector<9x16xf32>
    %cst_14 = arith.constant dense<0.000000e+00> : vector<64x16xf32>
    %31 = tpu.matmul %29, %30, %cst_14 {dimension_numbers = #tpu.dot_dimension_numbers<[1], [0], [0], [1], [0, 0, 1, 1], [], []>} : vector<64x9xf32>, vector<9x16xf32>, vector<64x16xf32> -> vector<64x16xf32>
    %32 = vector.shape_cast %31 : vector<64x16xf32> to vector<8x8x16xf32>
    %33 = vector.shape_cast %5 : vector<8x16xf32> to vector<8x1x16xf32>
    %34 = vector.broadcast %33 : vector<8x1x16xf32> to vector<8x8x16xf32>
    %35 = arith.addf %32, %34 : vector<8x8x16xf32>
    %36 = vector.shape_cast %9 : vector<8x16xf32> to vector<1x8x16xf32>
    %37 = vector.broadcast %36 : vector<1x8x16xf32> to vector<8x8x16xf32>
    %38 = arith.addf %35, %37 : vector<8x8x16xf32>
    %c0_15 = arith.constant 0 : index
    %c0_16 = arith.constant 0 : index
    %c0_17 = arith.constant 0 : index
    %c0_18 = arith.constant 0 : index
    %39 = vector.load %arg8[%c0_15, %c0_16, %c0_17, %c0_18] : memref<1x8x8x16xf32, #tpu.memory_space<vmem>>, vector<1x8x8x16xf32>
    %40 = vector.shape_cast %39 : vector<1x8x8x16xf32> to vector<8x8x16xf32>
    %41 = vector.shape_cast %38 : vector<8x8x16xf32> to vector<1x8x8x16xf32>
    tpu.vector_store %arg8[%c0_15, %c0_16, %c0_17, %c0_18], %41 {strides = array<i32>} : memref<1x8x8x16xf32, #tpu.memory_space<vmem>>, vector<1x8x8x16xf32>,
    return
  }
  func.func @transform_0(%arg0: i32, %arg1: i32, %arg2: i32) -> (i32, i32, i32) {
    %c0_i32 = arith.constant 0 : i32
    %c0_i32_0 = arith.constant 0 : i32
    return %arg0, %arg1, %c0_i32 : i32, i32, i32
  }
  func.func @transform_1(%arg0: i32, %arg1: i32, %arg2: i32) -> (i32, i32, i32) {
    %c0_i32 = arith.constant 0 : i32
    %c0_i32_0 = arith.constant 0 : i32
    return %arg0, %arg2, %c0_i32 : i32, i32, i32
  }
  func.func @transform_2(%arg0: i32, %arg1: i32, %arg2: i32) -> (i32, i32) {
    %c0_i32 = arith.constant 0 : i32
    %c0_i32_0 = arith.constant 0 : i32
    %c0_i32_1 = arith.constant 0 : i32
    return %c0_i32, %c0_i32_0 : i32, i32
  }
  func.func @transform_3(%arg0: i32, %arg1: i32, %arg2: i32) -> (i32, i32) {
    %c0_i32 = arith.constant 0 : i32
    %c0_i32_0 = arith.constant 0 : i32
    %c0_i32_1 = arith.constant 0 : i32
    return %c0_i32, %c0_i32_0 : i32, i32
  }
  func.func @transform_4(%arg0: i32, %arg1: i32, %arg2: i32) -> (i32, i32) {
    %c0_i32 = arith.constant 0 : i32
    %c0_i32_0 = arith.constant 0 : i32
    %c0_i32_1 = arith.constant 0 : i32
    return %c0_i32, %c0_i32_0 : i32, i32
  }
  func.func @transform_5(%arg0: i32, %arg1: i32, %arg2: i32) -> (i32, i32, i32, i32) {
    %c0_i32 = arith.constant 0 : i32
    %c0_i32_0 = arith.constant 0 : i32
    return %arg0, %arg1, %arg2, %c0_i32 : i32, i32, i32, i32
  }
}

</mosaic_0001>

<bundles_post_ra>
// kernel: tpu_custom_call.1
= control target key start
LH: loop header
LB: loop body
LE: loop exit
PB: predicated region body
PF: predicated region fallthrough
CT: control target
= control target key end

     0   :  { %s1933_s0 = inlined_call_operand.hbm [shape: f32[2,8,32], index: 0, kind: input, shape index: {}]   ;;  %s1934_s1 = inlined_call_operand.hbm [shape: f32[2,8,32], index: 1, kind: input, shape index: {}]   ;;  %s1935_s2 = inlined_call_operand.hbm [shape: f32[32,16], index: 2, kind: input, shape index: {}]   ;;  %s1936_s3 = inlined_call_operand.hbm [shape: f32[32,16], index: 3, kind: input, shape index: {}]   ;;  %s1937_s4 = inlined_call_operand.hbm [shape: f32[9,16], index: 4, kind: input, shape index: {}]   ;;  %s1938_s5 = inlined_call_operand.hbm [shape: f32[2,8,8,16], index: 5, kind: output, shape index: {}]  }
   0x1   :  { %1944 = sst [smem:[#allocation18_spill]] %s1935_s2 }
   0x2   :  { %1945 = sst [smem:[#allocation19_spill]] %s1936_s3 }
   0x3   :  { %1946 = sst [smem:[#allocation20_spill]] %s1937_s4 }
   0x4   :  { %10 = vsyncpa [#allocation3], 0 }
   0x5   :  { %12 = vsyncpa [#allocation3 + $0x1], 0 }
   0x6   :  { %13 = vsyncpa [#allocation6], 0 }
   0x7   :  { %15 = vsyncpa [#allocation6 + $0x1], 0 }
   0x8   :  { %16 = vsyncpa [#allocation9], 0 }
   0x9   :  { %17 = vsyncpa [#allocation4], 0 }
   0xa   :  { %19 = vsyncpa [#allocation4 + $0x1], 0  ;;  %s1523_s18 = smov 0   ;;  %s1525_s19 = smov 0  }
   0xb   :  { %s1527_s20 = smov 0   ;;  %s1529_s21 = smov 0  }
   0xc   :  { %s1531_s22 = smov 0   ;;  %s1533_s23 = smov 0  }
   0xd LB: > { %s1554_s24 = sadd.s32 4294967295, %s1476_s23   ;;  %s1013_s25 = sadd.s32 4294967294, %s1476_s23   ;;  %s1476_s23 = sphi %s1533_s23, %s25_s23   ;;  %s1472_s22 = sphi %s1531_s22, %s1973_s22   ;;  %s1468_s21 = sphi %s1529_s21, %s1972_s21   ;;  %s1464_s20 = sphi %s1527_s20, %s1971_s20   ;;  %s1460_s19 = sphi %s1525_s19, %s1970_s19   ;;  %s1456_s18 = sphi %s1523_s18, %s1969_s18  }
   0xe   : > { %p66_p0 = scmp.ne.s32.totalorder %s1460_s19, %s1456_s18  ;;  %p1939_p1 = scmp.eq.s32.totalorder %s1554_s24, 0 }
   0xf   : > { %p191_p3 = scmp.eq.s32.totalorder %s1013_s25, 1  ;;  %p1014_p5 = scmp.ge.s32.totalorder %s1476_s23, 1 }
  0x10   : > { %p1563_p4 = por %p1939_p1, %p66_p0  ;;  %p198_p7 = scmp.lt.s32.totalorder %s1476_s23, 3 }
  0x11   : > { %p1568_p6 = por %p191_p3, %p66_p0  ;;  %s1478_s29 = smov [#allocation7]  }
  0x12   : > { %s1947_s26 = scalar_select %p1563_p4, 1, 0 }
  0x13   : > { %s1948_s27 = scalar_select %p1568_p6, 1, 0 }
  0x14   : > { %p1573_p8 = pnand %p1014_p5, %p198_p7  ;;  %s210_s30 = sshll.u32 %s1478_s29, 4  ;;  %s1577_s30 = int_to_ptr.vmem [resolvable:$true] %s210_s30 }
  0x15   : > { %1949 = sst [smem:[#allocation17_spill]] %s1948_s27  ;;  %s1479_s7 = smov [#allocation8]  }
  0x16   : > { %s1950_s28 = scalar_select %p1573_p8, 1, 0 }
  0x17   : > { %p1149_p9 = pneg %p1573_p8  ;;  %s223_s8 = sshll.u32 %s1479_s7, 4  ;;  %s1588_s8 = int_to_ptr.vmem [resolvable:$true] %s223_s8 }
  0x18   : > { %s1480_s9 = smov [#allocation10]   ;;  %s1952_s2 = sld [smem:[#allocation18_spill]] }
  0x19   : > { %p1584_p11 = pnand %p1149_p9, %p1939_p1  ;;  %s1590_s10 = sshll.u32 %s1480_s9, 4  ;;  %s237_s10 = int_to_ptr.vmem [resolvable:$true] %s1590_s10 }
  0x1b   : > { %p1600_p13 = pneg %p1584_p11 }
  0x1e   : > { %s1238_s13 = scalar_lea.hbm %s1952_s2, 512 }
  0x1f   : > { %p1239_p12 = scmp.ne.s32.totalorder %s1952_s2, %s1238_s13  ;;  %p1245_p5 = scmp.lt.u32.totalorder %s1238_s13, %s1952_s2 }
  0x21   : > { %p1241_p0 = pnand %p1600_p13, %p1239_p12 }
  0x23   : > { %p1242_p3 = pneg %p1241_p0 }
  0x25   : > { %p1247_p7 = pnand %p1245_p5, %p1242_p3 }
  0x27   : > { %1250 = shalt.err (!%p1247_p7)
}
  0x28   : > { %s1251_s29 = scalar_lea.vmem %s1577_s30, 512  ;;  %p1259_p2 = scmp.lt.s32.totalorder %s1577_s30, %s1577_s30 }
  0x29   : > { %p1252_p9 = scmp.ne.s32.totalorder %s1577_s30, %s1251_s29  ;;  %p1260_p6 = scmp.lt.s32.totalorder %s1251_s29, %s1251_s29 }
  0x2b   : > { %p1254_p10 = pnand %p1252_p9, %p1600_p13  ;;  %p1261_p12 = por %p1260_p6, %p1259_p2 }
  0x2d   : > { %p1255_p1 = pneg %p1254_p10 }
  0x2f   : > { %p1262_p0 = pnand %p1261_p12, %p1255_p1 }
  0x31   : > { %1265 = shalt.err (!%p1262_p0)
}
  0x32   : > { %s1481_s7 = smov 128   ;;  %s1482_s9 = smov 8  }
  0x33   : > { %1152 = dma.hbm_to_vmem [thread:$0]  (!%p1584_p11), %s1952_s2, 512, %s1577_s30, [#allocation6], %s1481_s7, %s1481_s7, %s1482_s9  }
  0x34   : > { %s1954_s3 = sld [smem:[#allocation19_spill]] }
  0x3a   : > { %s1266_s15 = scalar_lea.hbm %s1954_s3, 512 }
  0x3b   : > { %p1267_p1 = scmp.ne.s32.totalorder %s1954_s3, %s1266_s15  ;;  %p1273_p10 = scmp.lt.u32.totalorder %s1266_s15, %s1954_s3 }
  0x3d   : > { %p1269_p2 = pnand %p1267_p1, %p1600_p13 }
  0x3f   : > { %p1270_p6 = pneg %p1269_p2 }
  0x41   : > { %p1275_p3 = pnand %p1273_p10, %p1270_p6 }
  0x43   : > { %1278 = shalt.err (!%p1275_p3)
}
  0x44   : > { %s1279_s30 = scalar_lea.vmem %s1588_s8, 512  ;;  %p1287_p12 = scmp.lt.s32.totalorder %s1588_s8, %s1588_s8 }
  0x45   : > { %p1280_p5 = scmp.ne.s32.totalorder %s1588_s8, %s1279_s30  ;;  %p1288_p0 = scmp.lt.s32.totalorder %s1279_s30, %s1279_s30 }
  0x47   : > { %p1282_p7 = pnand %p1280_p5, %p1600_p13  ;;  %p1289_p1 = por %p1288_p0, %p1287_p12 }
  0x49   : > { %p1283_p9 = pneg %p1282_p7 }
  0x4b   : > { %p1290_p2 = pnand %p1289_p1, %p1283_p9 }
  0x4d   : > { %1293 = shalt.err (!%p1290_p2)
}
  0x4e   : > { %1155 = dma.hbm_to_vmem [thread:$0]  (!%p1584_p11), %s1954_s3, 512, %s1588_s8, [#allocation9], %s1481_s7, %s1481_s7, %s1482_s9  }
  0x4f   : > { %s1955_s4 = sld [smem:[#allocation20_spill]] }
  0x55   : > { %s1294_s14 = scalar_lea.hbm %s1955_s4, 256 }
  0x56   : > { %p1295_p6 = scmp.ne.s32.totalorder %s1955_s4, %s1294_s14  ;;  %p1301_p5 = scmp.lt.u32.totalorder %s1294_s14, %s1955_s4 }
  0x58   : > { %p1297_p10 = pnand %p1295_p6, %p1600_p13 }
  0x5a   : > { %p1298_p3 = pneg %p1297_p10 }
  0x5c   : > { %p1303_p7 = pnand %p1301_p5, %p1298_p3 }
  0x5e   : > { %1306 = shalt.err (!%p1303_p7)
}
  0x5f   : > { %s1307_s30 = scalar_lea.vmem %s237_s10, 256  ;;  %p1315_p1 = scmp.lt.s32.totalorder %s237_s10, %s237_s10 }
  0x60   : > { %p1308_p9 = scmp.ne.s32.totalorder %s237_s10, %s1307_s30  ;;  %p1316_p2 = scmp.lt.s32.totalorder %s1307_s30, %s1307_s30 }
  0x62   : > { %p1310_p12 = pnand %p1308_p9, %p1600_p13  ;;  %p1317_p4 = por %p1316_p2, %p1315_p1 }
  0x64   : > { %p1311_p0 = pneg %p1310_p12 }
  0x66   : > { %p1318_p8 = pnand %p1317_p4, %p1311_p0 }
  0x68   : > { %1321 = shalt.err (!%p1318_p8)
}
  0x69   : > { %1158 = dma.hbm_to_vmem [thread:$0]  (!%p1584_p11), %s1955_s4, 256, %s237_s10, [#allocation9], %s1481_s7, %s1481_s7, %s1482_s9  }
  0x6a   : > { %s53_s16 = sadd.s32 1, %s1464_s20  ;;  %s44_s6 = sadd.s32 1, %s1472_s22 }
  0x6b   : > { %p60_p4 = scmp.ne.s32.totalorder %s1464_s20, %s1460_s19  ;;  %p46_p8 = scmp.ge.s32.totalorder %s44_s6, 2 }
  0x6c   : > { %p61_p13 = scmp.eq.s32.totalorder %s1476_s23, 0  ;;  %p1956_p6 = scmp.eq.s32.totalorder %s1554_s24, 1 }
  0x6d   : > { %p1173_p3 = scmp.lt.s32.totalorder %s1476_s23, 2  ;;  %s1975_s6 = smov (%p46_p8, %s44_s6), 0 }
  0x6e   : > { %p1679_p10 = por %p1956_p6, %p60_p4  ;;  %p62_p5 = por %p61_p13, %p60_p4 }
  0x6f   : > { %s250_s12 = sand.u32 1, %s1464_s20   ;;  %s48_s13 = ssub.s32 %s1472_s22, %s1975_s6 }
  0x70   : > { %s1957_s11 = scalar_select %p1679_p10, 1, 0 }
  0x71   : > { %p51_p11 = scmp.eq.s32.totalorder %s48_s13, 0  ;;  %s1689_s10 = sshll.u32 %s250_s12, 3 }
  0x72   : > { %s1020_s7 = sshll.u32 %s1472_s22, 7  ;;  %s254_s25 = scalar_lea.vmem [#allocation2], %s1689_s10 }
  0x73   : > { %s1693_s9 = scalar_select %p51_p11, %s1464_s20, %s53_s16  }
  0x74   : > { %s1698_s17 = scalar_lea.hbm %s1933_s0, %s1020_s7  ;;  %s262_s29 = sshll.u32 %s254_s25, 4  ;;  %s1701_s29 = int_to_ptr.vmem [resolvable:$true] %s262_s29 }
  0x75   : > { %p1705_p7 = pnand %p1173_p3, %p62_p5  ;;  %s1712_s16 = scalar_lea.hbm %s1934_s1, %s1020_s7 }
  0x76   : > { %s269_s13 = sand.u32 1, %s1476_s23   ;;  %s251_s14 = scalar_lea.sflag [#allocation3], %s250_s12 }
  0x77   : > { %s1322_s15 = scalar_lea.hbm %s1698_s17, 128  ;;  %p1324_p12 = pneg %p1705_p7 }
  0x78   : > { %p1323_p9 = scmp.ne.s32.totalorder %s1698_s17, %s1322_s15  ;;  %s1327_s3 = scalar_lea.hbm %s1933_s0, 256 }
  0x79   : > { %p1328_p2 = scmp.lt.u32.totalorder %s1698_s17, %s1933_s0  ;;  %p1329_p4 = scmp.lt.u32.totalorder %s1327_s3, %s1322_s15 }
  0x7a   : > { %p1325_p0 = pnand %p1324_p12, %p1323_p9  ;;  %p1331_p13 = scmp.lt.u32.totalorder %s1322_s15, %s1698_s17 }
  0x7b   : > { %p1330_p8 = por %p1329_p4, %p1328_p2 }
  0x7c   : > { %p1326_p1 = pneg %p1325_p0 }
  0x7d   : > { %p1332_p6 = por %p1331_p13, %p1330_p8 }
  0x7f   : > { %p1333_p3 = pnand %p1332_p6, %p1326_p1 }
  0x81   : > { %1336 = shalt.err (!%p1333_p3)
}
  0x82   : > { %s1337_s12 = scalar_lea.vmem %s1701_s29, 128  ;;  %s1483_s2 = smov [#allocation2]  }
  0x83   : > { %p1338_p5 = scmp.ne.s32.totalorder %s1701_s29, %s1337_s12  ;;  %s1342_s7 = sshll.u32 %s1483_s2, 4  ;;  %s1343_s7 = int_to_ptr.vmem [resolvable:$false] %s1342_s7 }
  0x84   : > { %s1344_s4 = scalar_lea.vmem %s1343_s7, 256  ;;  %p1345_p0 = scmp.lt.s32.totalorder %s1701_s29, %s1343_s7 }
  0x85   : > { %p1340_p11 = pnand %p1338_p5, %p1324_p12  ;;  %p1346_p2 = scmp.lt.s32.totalorder %s1344_s4, %s1337_s12 }
  0x87   : > { %p1341_p9 = pneg %p1340_p11  ;;  %p1347_p4 = por %p1346_p2, %p1345_p0 }
  0x89   : > { %p1348_p8 = pnand %p1347_p4, %p1341_p9 }
  0x8b   : > { %1351 = shalt.err (!%p1348_p8)
}
  0x8c   : > { %1162 = dma.hbm_to_vmem [thread:$0]  (!%p1705_p7), %s1698_s17, 128, %s1701_s29, %s251_s14  }
  0x8d   : > { %s273_s3 = scalar_lea.vmem [#allocation5], %s1689_s10  ;;  %s270_s15 = scalar_lea.sflag [#allocation6], %s269_s13 }
  0x8e   : > { %s281_s27 = sshll.u32 %s273_s3, 4  ;;  %s1352_s25 = scalar_lea.hbm %s1712_s16, 128  ;;  %s282_s27 = int_to_ptr.vmem [resolvable:$true] %s281_s27 }
  0x8f   : > { %p1353_p1 = scmp.ne.s32.totalorder %s1712_s16, %s1352_s25  ;;  %s1357_s2 = scalar_lea.hbm %s1934_s1, 256 }
  0x90   : > { %p1358_p3 = scmp.lt.u32.totalorder %s1712_s16, %s1934_s1  ;;  %p1359_p5 = scmp.lt.u32.totalorder %s1357_s2, %s1352_s25 }
  0x91   : > { %p1355_p13 = pnand %p1353_p1, %p1324_p12  ;;  %p1361_p9 = scmp.lt.u32.totalorder %s1352_s25, %s1712_s16 }
  0x92   : > { %p1360_p11 = por %p1359_p5, %p1358_p3 }
  0x93   : > { %p1356_p6 = pneg %p1355_p13 }
  0x94   : > { %p1362_p0 = por %p1361_p9, %p1360_p11 }
  0x96   : > { %p1363_p2 = pnand %p1362_p0, %p1356_p6 }
  0x98   : > { %1366 = shalt.err (!%p1363_p2)
}
  0x99   : > { %s1367_s10 = scalar_lea.vmem %s282_s27, 128  ;;  %s1484_s17 = smov [#allocation5]  }
  0x9a   : > { %p1368_p4 = scmp.ne.s32.totalorder %s282_s27, %s1367_s10  ;;  %s1372_s29 = sshll.u32 %s1484_s17, 4  ;;  %s1373_s29 = int_to_ptr.vmem [resolvable:$false] %s1372_s29 }
  0x9b   : > { %s1374_s13 = scalar_lea.vmem %s1373_s29, 256  ;;  %p1375_p13 = scmp.lt.s32.totalorder %s282_s27, %s1373_s29 }
  0x9c   : > { %p1370_p8 = pnand %p1368_p4, %p1324_p12  ;;  %p1376_p10 = scmp.lt.s32.totalorder %s1374_s13, %s1367_s10 }
  0x9e   : > { %p1371_p1 = pneg %p1370_p8  ;;  %p1377_p3 = por %p1376_p10, %p1375_p13 }
  0xa0   : > { %p1378_p5 = pnand %p1377_p3, %p1371_p1 }
  0xa2   : > { %1381 = shalt.err (!%p1378_p5)
}
  0xa3   : > { %1165 = dma.hbm_to_vmem [thread:$0]  (!%p1705_p7), %s1712_s16, 128, %s282_s27, %s270_s15  }
  0xa4   : > { %p1959_p6 = scmp.ne.s32.totalorder %s1950_s28, 0 }
  0xa5   : > { %s1765_s14 = sand.u32 (!%p1959_p6), 1, %s1460_s19   ;;  %p1960_p10 = scmp.ne.s32.totalorder (!%p1959_p6), %s1947_s26, 0 }
  0xa6   : > { %290 = sbr.rel (%p1959_p6) target bundleno = 562 (0x232), region = 40  ;;  %s1024_s3 = sshll.u32 (!%p1959_p6), %s1765_s14, 3 }
  0xa7   : > { %s293_s25 = scalar_lea.sflag (!%p1959_p6), [#allocation3], %s1765_s14  ;;  %s1769_s8 = scalar_lea.vmem (!%p1959_p6), [#allocation2], %s1024_s3 }
  0xad   : > { %1435 = dma.done.wait (%p1960_p10), %s293_s25, 128  }
  0xae   : > { %1437 = vsyncadd (%p1960_p10), %s293_s25, 4294967168  ;;  %s301_s30 = sand.u32 1, %s1554_s24   ;;  %s1776_s16 = scalar_lea.vmem [#allocation5], %s1024_s3 }
  0xaf   : > { %s302_s28 = scalar_lea.sflag [#allocation6], %s301_s30 }
  0xb0   : > { %1439 = dma.done.wait (%p1960_p10), %s302_s28, 128  }
  0xb1   : > { %1441 = vsyncadd (%p1960_p10), %s302_s28, 4294967168  ;;  %p1961_p7 = scmp.eq.s32.totalorder %s1554_s24, 0 }
  0xb3   : > { %1443 = dma.done.wait (%p1961_p7), [#allocation6], 512   ;;  %p1962_p12 = pmov %p1961_p7 }
  0xb4   : > { %p1963_p11 = pmov %p1961_p7 }
  0xb5   : > { %1445 = vsyncadd (%p1962_p12), [#allocation6], 4294966784 }
  0xb6   : > { %1447 = dma.done.wait (%p1963_p11), [#allocation9], 768   ;;  %p1964_p9 = pmov %p1961_p7 }
  0xb7   : > { %v509_v0 = vlaneseq  ;;  %v1485_v1 = vmov 0.0|0.0   ;;  %vm1486_vm0 = vmmov 0   ;;  %v1487_v2 = vmov 0.0   ;;  %v353_v7 = vld [vmem:[#allocation7] sm:$0xff]  ;;  %v354_v8 = vld [vmem:[#allocation7 + $0x8] sm:$0xff]  ;;  %v355_v12 = vld [vmem:[#allocation7 + $0x10] sm:$0xff] }
  0xb8   : > { %1449 = vsyncadd (%p1964_p9), [#allocation9], 4294966528  ;;  %1113 = vmatprep.subr.bf16.mxu1 %v1485_v1  ;;  %1083 = vmatprep.mubr.msk.f32.mxu1 %vm1486_vm0, %v1487_v2  ;;  %vm630_vm2 = vcmask 1040384   ;;  %v1114_v11 = vpack.c.bf16 %v354_v8, %v353_v7  ;;  %v356_v13 = vld [vmem:[#allocation7 + $0x18] sm:$0xff]  ;;  %v603_v15 = vld [vmem:[#allocation10] sm:$0xff]  ;;  %vm1488_vm4 = vmmov 1  }
  0xb9   : > { %v1792_v3 = vshrl.u32 %v509_v0, 7  ;;  %v1794_v4 = vand.u32 127, %v509_v0  ;;  %v604_v16 = vld [vmem:[#allocation10 + $0x8] sm:$0x1]  ;;  %vm1126_vm5 = vmpackc.low %vm630_vm2, %vm1488_vm4  ;;  %v1117_v21 = vpack.c.bf16 %v356_v13, %v355_v12  ;;  %v432_v24 = vld [vmem:[#allocation8] sm:$0xff]  ;;  %vm357_vm6 = vcmask 261120  }
  0xba   : > { %1115 = vmatpush3.bf16.msra.mxu1 %v1114_v11  ;;  %v1125_v20 = vpack.c.bf16 %v604_v16, %v603_v15  ;;  %v433_v25 = vld [vmem:[#allocation8 + $0x8] sm:$0xff]  ;;  %v434_v32 = vld [vmem:[#allocation8 + $0x10] sm:$0xff]  ;;  %v435_v33 = vld [vmem:[#allocation8 + $0x18] sm:$0xff]  ;;  %vm605_vm7 = vcmask 72704   ;;  %v1489_v62 = vmov 1966171168  }
  0xbb   : > { %v517_v5 = vsub.s32 %v1792_v3, %v1794_v4  ;;  %v1799_v9 = vsub.s32 0, %v1792_v3  ;;  %v539_v10 = vsub.s32 2, %v1792_v3  ;;  %v532_v18 = vsub.s32 1, %v1792_v3  ;;  %1116 = vmatprep.subr.bf16.mxu1 %v1485_v1  ;;  %v352_v30 = vld [vmem:[%s1769_s8] sm:$0xff]  ;;  %v431_v41 = vld [vmem:[%s1776_s16] sm:$0xff]  ;;  %s1029_s24 = sshll.u32 %s1765_s14, 6 }
  0xbc   : > { %v546_v19 = vsub.s32 3, %v1792_v3  ;;  %1127 = vmatprep.subr.msk.bf16.mxu0 %vm1126_vm5, %v1125_v20  ;;  %v553_v28 = vsub.s32 4, %v1792_v3  ;;  %v560_v29 = vsub.s32 5, %v1792_v3  ;;  %v1120_v31 = vpack.c.bf16 %v433_v25, %v432_v24  ;;  %s1849_s26 = scalar_lea.vmem [#allocation11], %s1029_s24  ;;  %s1054_s27 = sshll.u32 %s1468_s21, 10 }
  0xbd   : > { %vm518_vm1 = vcmp.gt.s32.totalorder %v517_v5, 4294967292  ;;  %1130 = vmatpush3.bf16.msk.msra.mxu0 %vm1126_vm5, %v1125_v20  ;;  %v567_v36 = vsub.s32 6, %v1792_v3  ;;  %v574_v37 = vsub.s32 7, %v1792_v3  ;;  %v1123_v38 = vpack.c.bf16 %v435_v33, %v434_v32  ;;  %s871_s15 = sshll.u32 %s1849_s26, 4  ;;  %s1877_s7 = scalar_lea.hbm %s1938_s5, %s1054_s27  ;;  %s1879_s15 = int_to_ptr.vmem [resolvable:$true] %s871_s15 }
  0xbe   : > { %v519_v6 = vsel %vm518_vm1, %v517_v5, 4294967292  ;;  %1118 = vmatpush3.bf16.msra.mxu1 %v1117_v21  ;;  %v742_v63 = vunpack.c.l.s4 %v1489_v62  ;;  %s855_s21 = scalar_lea.sflag [#allocation4], %s1765_s14  ;;  %s1382_s4 = scalar_lea.vmem %s1879_s15, 1024 }
  0xbf   : > { %vm520_vm3 = vcmp.lt.s32.totalorder %v519_v6, 4  ;;  %1119 = vmatprep.subr.bf16.mxu1 %v1485_v1  ;;  %p1383_p0 = scmp.ne.s32.totalorder %s1879_s15, %s1382_s4  ;;  %p1965_p2 = scmp.ne.s32.totalorder %s1957_s11, 0 }
  0xc0   : > { %v521_v14 = vsel %vm520_vm3, %v519_v6, 4  ;;  %v743_v0 = vunpack.c.0.s8 %v742_v63  ;;  %s1490_s10 = smov [#allocation11]  }
  0xc1   : > { %v522_v17 = vadd.s32 4, %v521_v14  ;;  %1084 = vmatmul.mubr.msk.f32.vlgmr.msra.gmra.mrb[0].mxu1 %vm357_vm6, %v352_v30  ;;  %p1384_p4 = pnand %p1383_p0, %p1965_p2  ;;  %s1386_s17 = sshll.u32 %s1490_s10, 4  ;;  %s1387_s17 = int_to_ptr.vmem [resolvable:$false] %s1386_s17 }
  0xc2   : > { %1121 = vmatpush3.bf16.msra.mxu1 %v1120_v31  ;;  %1094 = vmatprep.mubr.msk.f32.mxu1 %vm1486_vm0, %v1487_v2  ;;  %vm845_vm0 = vcmask 130048   ;;  %s1388_s29 = scalar_lea.vmem %s1387_s17, 2048  ;;  %p1389_p1 = scmp.lt.s32.totalorder %s1879_s15, %s1387_s17 }
  0xc3   : > { %v526_v22 = vrot.slane %v522_v17, %v1799_v9  ;;  %v540_v23 = vrot.slane %v522_v17, %v539_v10  ;;  %v533_v26 = vrot.slane %v522_v17, %v532_v18  ;;  %v547_v27 = vrot.slane %v522_v17, %v546_v19  ;;  %1122 = vmatprep.subr.bf16.mxu1 %v1485_v1  ;;  %p1385_p8 = pneg %p1384_p4  ;;  %p1390_p13 = scmp.lt.s32.totalorder %s1388_s29, %s1382_s4 }
  0xc4   : > { %v554_v34 = vrot.slane %v522_v17, %v553_v28  ;;  %v561_v35 = vrot.slane %v522_v17, %v560_v29  ;;  %v568_v39 = vrot.slane %v522_v17, %v567_v36  ;;  %v575_v40 = vrot.slane %v522_v17, %v574_v37 }
  0xc5   : > { %528 = vbcast.lane.b32.xlu0 %v526_v22, 256  ;;  %542 = vbcast.lane.b32.xlu1 %v540_v23, 256  ;;  %v746_v1 = vsub.s32 %v743_v0, %v1792_v3  ;;  %p1391_p3 = por %p1390_p13, %p1389_p1 }
  0xc6   : > { %1124 = vmatpush3.bf16.msra.mxu1 %v1123_v38 }
  0xc7   : > { %p1392_p5 = pnand %p1391_p3, %p1385_p8 }
  0xc9   : > { %535 = vbcast.lane.b32.xlu0 %v533_v26, 256  ;;  %549 = vbcast.lane.b32.xlu1 %v547_v27, 256 }
  0xca   : > { %1095 = vmatmul.mubr.msk.f32.vlgmr.msra.gmra.mrb[2].mxu1 %vm357_vm6, %v431_v41 }
  0xcd   : > { %556 = vbcast.lane.b32.xlu0 %v554_v34, 256  ;;  %563 = vbcast.lane.b32.xlu1 %v561_v35, 256 }
  0xd1   : > { %570 = vbcast.lane.b32.xlu0 %v568_v39, 256  ;;  %577 = vbcast.lane.b32.xlu1 %v575_v40, 256 }
 0x137   : > { %v529_v42 = vpop.permute.xlu0 %528  ;;  %v543_v43 = vpop.permute.xlu1 %542 }
 0x138   : > { %vm579_vm8 = vcmp.eq.s32.totalorder %v529_v42, %v1794_v4  ;;  %vm581_vm9 = vcmp.eq.s32.totalorder %v543_v43, %v1794_v4 }
 0x139   : > { %v1032_v44 = vsel %vm579_vm8, 1.0, %v1487_v2  ;;  %v1034_v47 = vsel %vm581_vm9, 1.0, %v1487_v2 }
 0x13a   : > { %1101 = vmatprep.mubr.msk.f32.mxu0 %vm605_vm7, %v1032_v44 }
 0x13b   : > { %v536_v45 = vpop.permute.xlu0 %535  ;;  %v550_v46 = vpop.permute.xlu1 %549 }
 0x13c   : > { %vm580_vm10 = vcmp.eq.s32.totalorder %v536_v45, %v1794_v4  ;;  %vm582_vm11 = vcmp.eq.s32.totalorder %v550_v46, %v1794_v4 }
 0x13d   : > { %v1033_v48 = vsel %vm580_vm10, 1.0, %v1487_v2  ;;  %v1035_v49 = vsel %vm582_vm11, 1.0, %v1487_v2 }
 0x13e   : > { %1102 = vmatmul.mubr.msk.f32.vlgmr.msra.gmra.mrb[0].mxu0 %vm605_vm7, %v1033_v48 }
 0x13f   : > { %1104 = vmatprep.mubr.msk.f32.mxu0 %vm605_vm7, %v1034_v47  ;;  %v557_v50 = vpop.permute.xlu0 %556  ;;  %v564_v51 = vpop.permute.xlu1 %563 }
 0x140   : > { %vm583_vm12 = vcmp.eq.s32.totalorder %v557_v50, %v1794_v4  ;;  %vm584_vm13 = vcmp.eq.s32.totalorder %v564_v51, %v1794_v4 }
 0x141   : > { %v1036_v52 = vsel %vm583_vm12, 1.0, %v1487_v2  ;;  %v1037_v53 = vsel %vm584_vm13, 1.0, %v1487_v2 }
 0x142   : > { %1105 = vmatmul.mubr.msk.f32.gmra.mrb[2].mxu0 %vm605_vm7, %v1035_v49 }
 0x143   : > { %1107 = vmatprep.mubr.msk.f32.mxu0 %vm605_vm7, %v1036_v52  ;;  %v571_v54 = vpop.permute.xlu0 %570  ;;  %v578_v55 = vpop.permute.xlu1 %577 }
 0x144   : > { %vm585_vm14 = vcmp.eq.s32.totalorder %v571_v54, %v1794_v4  ;;  %vm586_vm15 = vcmp.eq.s32.totalorder %v578_v55, %v1794_v4 }
 0x145   : > { %v1038_v56 = vsel %vm585_vm14, 1.0, %v1487_v2  ;;  %v1039_v57 = vsel %vm586_vm15, 1.0, %v1487_v2 }
 0x146   : > { %1108 = vmatmul.mubr.msk.f32.gmra.mrb[4].mxu0 %vm605_vm7, %v1037_v53 }
 0x147   : > { %1110 = vmatprep.mubr.msk.f32.mxu0 %vm605_vm7, %v1038_v56 }
 0x14a   : > { %1111 = vmatmul.mubr.msk.f32.gmra.mrb[6].mxu0 %vm605_vm7, %v1039_v57 }
 0x194   : > { %v427_v58 = vpop.f32.mrb[0].mxu1 }
 0x195   : > { %v1085_v59 = vpop.f32.mrb[1].mxu1  ;;  %v747_v4 = vrot.slane %v427_v58, %v746_v1  ;;  %v740_v5 = vcombine.high %v427_v58, %v427_v58 }
 0x197   : > { %v755_v6 = vcombine.high %v747_v4, %v747_v4  ;;  %v754_v7 = vrot.slane %v740_v5, %v746_v1  ;;  %v763_v8 = vrot.slane %v747_v4, %v746_v1 }
 0x199   : > { %v777_v2 = vrot.slane %v755_v6, %v746_v1  ;;  %v756_v10 = vcombine.high %v754_v7, %v754_v7  ;;  %v792_v13 = vrot.slane %v763_v8, %v1799_v9  ;;  %v785_v14 = vcombine.high %v763_v8, %v763_v8 }
 0x19a   : > { %v770_v21 = vrot.slane %v754_v7, %v746_v1 }
 0x19b   : > { %v796_v11 = vrot.slane %v777_v2, %v1799_v9  ;;  %v787_v12 = vcombine.high %v777_v2, %v777_v2  ;;  %v784_v3 = vrot.slane %v756_v10, %v746_v1  ;;  %v800_v20 = vrot.slane %v785_v14, %v1799_v9 }
 0x19c   : > { %v808_v30 = vrot.slane %v770_v21, %v1799_v9  ;;  %v786_v34 = vcombine.high %v770_v21, %v770_v21 }
 0x19d   : > { %v1839_v60 = vpop.f32.mrb[2].mxu1  ;;  %v804_v18 = vrot.slane %v787_v12, %v1799_v9  ;;  %v812_v27 = vrot.slane %v784_v3, %v1799_v9  ;;  %v788_v28 = vcombine.high %v784_v3, %v784_v3 }
 0x19e   : > { %v1096_v61 = vpop.f32.mrb[3].mxu1  ;;  %v816_v42 = vrot.slane %v786_v34, %v1799_v9 }
 0x19f   : > { %v820_v37 = vrot.slane %v788_v28, %v1799_v9 }
 0x211   : > { %v1103_v15 = vpop.f32.mrb[0].mxu0 }
 0x212   : > { %v830_v16 = vadd.f32 %v1103_v15, %v796_v11  ;;  %v700_v17 = vpop.f32.mrb[1].mxu0 }
 0x213   : > { %v829_v19 = vadd.f32 %v792_v13, %v700_v17 }
 0x214   : > { %v838_v22 = vadd.f32 %v830_v16, %v1839_v60 }
 0x215   : > { %v837_v23 = vadd.f32 %v829_v19, %v1839_v60  ;;  %v1106_v24 = vpop.f32.mrb[2].mxu0 }
 0x216   : > { %v832_v25 = vadd.f32 %v1106_v24, %v804_v18  ;;  %847 = vst.msk [vmem:[%s1849_s26 + $0x8] sm:$0xff] %vm845_vm0, %v838_v22  ;;  %v710_v26 = vpop.f32.mrb[3].mxu0 }
 0x217   : > { %846 = vst.msk [vmem:[%s1849_s26] sm:$0xff] %vm845_vm0, %v837_v23  ;;  %v831_v29 = vadd.f32 %v800_v20, %v710_v26 }
 0x218   : > { %v840_v31 = vadd.f32 %v832_v25, %v1839_v60 }
 0x219   : > { %v839_v32 = vadd.f32 %v831_v29, %v1839_v60  ;;  %v1109_v33 = vpop.f32.mrb[4].mxu0 }
 0x21a   : > { %849 = vst.msk [vmem:[%s1849_s26 + $0x18] sm:$0xff] %vm845_vm0, %v840_v31  ;;  %v834_v35 = vadd.f32 %v1109_v33, %v812_v27  ;;  %v720_v36 = vpop.f32.mrb[5].mxu0 }
 0x21b   : > { %848 = vst.msk [vmem:[%s1849_s26 + $0x10] sm:$0xff] %vm845_vm0, %v839_v32  ;;  %v833_v38 = vadd.f32 %v808_v30, %v720_v36 }
 0x21c   : > { %v842_v39 = vadd.f32 %v834_v35, %v1839_v60 }
 0x21d   : > { %v841_v40 = vadd.f32 %v833_v38, %v1839_v60  ;;  %v1112_v41 = vpop.f32.mrb[6].mxu0 }
 0x21e   : > { %851 = vst.msk [vmem:[%s1849_s26 + $0x28] sm:$0xff] %vm845_vm0, %v842_v39  ;;  %v836_v43 = vadd.f32 %v1112_v41, %v820_v37  ;;  %v730_v44 = vpop.f32.mrb[7].mxu0 }
 0x21f   : > { %850 = vst.msk [vmem:[%s1849_s26 + $0x20] sm:$0xff] %vm845_vm0, %v841_v40  ;;  %v835_v45 = vadd.f32 %v816_v42, %v730_v44 }
 0x220   : > { %v844_v46 = vadd.f32 %v836_v43, %v1839_v60 }
 0x221   : > { %v843_v9 = vadd.f32 %v835_v45, %v1839_v60 }
 0x222   : > { %853 = vst.msk [vmem:[%s1849_s26 + $0x38] sm:$0xff] %vm845_vm0, %v844_v46 }
 0x223   : > { %852 = vst.msk [vmem:[%s1849_s26 + $0x30] sm:$0xff] %vm845_vm0, %v843_v9 }
 0x224   : > { %1395 = shalt.err (!%p1392_p5)
}
 0x225   : > { %s1396_s13 = scalar_lea.hbm %s1877_s7, 1024  ;;  %s1400_s8 = scalar_lea.hbm %s1938_s5, 2048 }
 0x226   : > { %p1397_p6 = scmp.ne.s32.totalorder %s1877_s7, %s1396_s13  ;;  %p1401_p12 = scmp.lt.u32.totalorder %s1877_s7, %s1938_s5 }
 0x227   : > { %p1402_p11 = scmp.lt.u32.totalorder %s1400_s8, %s1396_s13  ;;  %p1404_p0 = scmp.lt.u32.totalorder %s1396_s13, %s1877_s7 }
 0x228   : > { %p1398_p10 = pnand %p1397_p6, %p1965_p2 }
 0x229   : > { %p1403_p9 = por %p1402_p11, %p1401_p12 }
 0x22a   : > { %p1399_p7 = pneg %p1398_p10 }
 0x22b   : > { %p1405_p4 = por %p1404_p0, %p1403_p9 }
 0x22d   : > { %p1406_p8 = pnand %p1405_p4, %p1399_p7 }
 0x22f   : > { %1409 = shalt.err (!%p1406_p8)
}
 0x230   : > { %s1491_s16 = smov 128   ;;  %s1492_s24 = smov 8  }
 0x231   : > { %1147 = dma.vmem_to_hbm [thread:$0]  (%p1965_p2), %s1879_s15, 1024, %s1877_s7, %s855_s21, %s1491_s16, %s1491_s16, %s1492_s24  }
 0x232 PF: > { %s1966_s26 = sld [smem:[#allocation17_spill]]  ;;  %s886_s27 = sand.u32 1, %s1456_s18  }
 0x233   : > { %p1968_p13 = scmp.ge.s32.totalorder %s1476_s23, 2  ;;  %s887_s12 = scalar_lea.sflag [#allocation4], %s886_s27 }
 0x238   : > { %p1967_p1 = scmp.ne.s32.totalorder %s1966_s26, 0 }
 0x23a   : > { %p1167_p3 = pnand %p1968_p13, %p1967_p1 }
 0x23c   : > { %1451 = dma.done.wait (!%p1167_p3), %s887_s12, 1024  }
 0x23d   : > { %1453 = vsyncadd (!%p1167_p3), %s887_s12, 4294966272  ;;  %s25_s23 = sadd.s32 1, %s1476_s23   ;;  %s1969_s18 = smov %s1460_s19 }
 0x23e   : > { %p22_p5 = scmp.ge.s32.totalorder %s25_s23, 4   ;;  %s1970_s19 = smov %s1464_s20 }
 0x23f   : > { %s1971_s20 = smov %s1693_s9  ;;  %s1972_s21 = smov %s1472_s22 }
 0x240   : > { %s1973_s22 = smov %s1975_s6  ;;  %24 = sbr.rel (!%p22_p5) target bundleno = 13 (0xd), region = 110 }
 0x247   :  { %892 = vsyncpa [#allocation3], 1 }
 0x248   :  { %894 = vsyncpa [#allocation3 + $0x1], 1 }
 0x249   :  { %895 = vsyncpa [#allocation6], 1 }
 0x24a   :  { %897 = vsyncpa [#allocation6 + $0x1], 1 }
 0x24b   :  { %898 = vsyncpa [#allocation9], 1 }
 0x24c   :  { %899 = vsyncpa [#allocation4], 1 }
 0x24d   :  { %901 = vsyncpa [#allocation4 + $0x1], 1 }

</bundles_post_ra>
